<compile_context>
chip_gen: v7x
topology: tpu7x:2x2x1
jax: 0.10.0
libtpu: 0.0.40
codegen_flags: <defaults>
</compile_context>

<pallas_src>
import functools

import jax
import jax.numpy as jnp
from jax import lax
from jax.experimental import pallas as pl
from jax.experimental.pallas import tpu as pltpu

BN_EPS = 1e-5          # model_config.HEAD.BATCHNORM_EPS default
NORM_EPS = 1e-12       # F.normalize eps


def _round_up(v, m):
    return (v + m - 1) // m * m


def _stats_kernel(x_ref, w1_ref, stats_ref):
    """Phase A: accumulate per-channel sum / sum-of-squares of u = x @ W1 (no bias).

    Zero pad rows contribute exactly nothing, so no row mask is needed, and no
    batch-size constant is baked into the kernel.  The bias is folded back in
    analytically in the wrapper (mean_h = mean_u + b1, var_h = var_u).
    Output block is indexed by the leading "parallel" split axis -> per-core
    partial stats on v7x, reduced in the wrapper.
    """
    @pl.when(pl.program_id(1) == 0)
    def _():
        stats_ref[...] = jnp.zeros_like(stats_ref)

    u = jnp.dot(x_ref[...], w1_ref[...], preferred_element_type=jnp.float32)
    s = jnp.concatenate([jnp.sum(u, axis=0, keepdims=True),
                         jnp.sum(u * u, axis=0, keepdims=True)], axis=0)   # (2, d_hidden)
    stats_ref[...] += s[None, :, :]


def _apply_kernel(x_ref, w1f_ref, b1f_ref, wf_ref, bf_ref,
                  emb_ref, s0_ref, s1_ref, *, d_proj, k0):
    """Phase B: (BN-folded) Linear1 -> ReLU -> fused [Linear2|proto0|proto1] -> L2 norm."""
    h = jnp.dot(x_ref[...], w1f_ref[...],
                preferred_element_type=jnp.float32) + b1f_ref[...]
    h = jnp.maximum(h, 0.0)                                           # BN already folded

    # Single fused MXU pass: y = [z | z@P0^T | z@P1^T] with z = h@W2^T + b2.
    y = jnp.dot(h.astype(wf_ref.dtype), wf_ref[...],
                preferred_element_type=jnp.float32) + bf_ref[...]

    # F.normalize(z, dim=1): per-row rsqrt on clamped sum-of-squares; the prototype
    # heads have no bias, so the same row scale applies to the whole fused slab.
    z = y[:, :d_proj]
    inv = lax.rsqrt(jnp.maximum(jnp.sum(z * z, axis=1, keepdims=True),
                                NORM_EPS * NORM_EPS))
    emb_ref[...] = (z * inv).astype(emb_ref.dtype)
    s0_ref[...] = (y[:, d_proj:d_proj + k0] * inv).astype(s0_ref.dtype)
    s1_ref[...] = (y[:, d_proj + k0:] * inv).astype(s1_ref.dtype)


def swav_prototypes_head(x, params, *, tile_n=4096, n_split=2,
                         compute_dtype=jnp.bfloat16):
    """x: (N, dims[0]) float32.  Returns [embeddings, scores0, scores1].

    compute_dtype=jnp.bfloat16 (default) halves HBM read traffic and MXU pushes;
    accumulation and all BN / normalize elementwise math stays f32.
    n_split splits the phase-A statistics pass across TensorCores (v7x megacore).
    """
    n, d_in = x.shape
    d_hidden = params["w1"].shape[0]
    d_proj = params["w2"].shape[0]
    k0 = params["p0"].shape[0]
    k1 = params["p1"].shape[0]
    d_out = d_proj + k0 + k1

    cd = compute_dtype
    w1_t = params["w1"].T.astype(jnp.float32)            # (d_in, d_hidden)
    b1 = params["b1"].astype(jnp.float32)
    gamma = params["gamma"].astype(jnp.float32)
    beta = params["beta"].astype(jnp.float32)
    w2_t = params["w2"].T.astype(jnp.float32)            # (d_hidden, d_proj)
    b2 = params["b2"].astype(jnp.float32)
    p0_t = params["p0"].T.astype(jnp.float32)            # (d_proj, k0)
    p1_t = params["p1"].T.astype(jnp.float32)            # (d_proj, k1)

    # Fused output weights: y = h @ W_fused + b_fused == [z | z@P0^T | z@P1^T].
    w_fused = jnp.concatenate([w2_t, w2_t @ p0_t, w2_t @ p1_t], axis=1)   # (d_hidden, d_out)
    b_fused = jnp.concatenate([b2, b2 @ p0_t, b2 @ p1_t])[None, :]        # (1, d_out)

    # Batch tiling: sublane-aligned tile (8 rows for f32 operands, 16 for bf16).
    align = 8 if jnp.dtype(cd).itemsize >= 4 else 16
    tile = max(align, min(_round_up(tile_n, align), _round_up(n, align)))
    n_tiles0 = -(-n // tile)
    n_split = max(1, min(n_split, n_tiles0))
    n_tiles = _round_up(n_tiles0, n_split)
    n_pad = n_tiles * tile
    tiles_per_split = n_tiles // n_split

    x_p = x.astype(cd)
    if n_pad != n:
        x_p = jnp.pad(x_p, ((0, n_pad - n), (0, 0)))

    # ---- phase A: full-batch BN statistics (split-parallel partial accumulation) ----
    stats = pl.pallas_call(
        _stats_kernel,
        grid=(n_split, tiles_per_split),
        in_specs=[
            pl.BlockSpec((tile, d_in), lambda c, i: (c * tiles_per_split + i, 0)),
            pl.BlockSpec((d_in, d_hidden), lambda c, i: (0, 0)),
        ],
        out_specs=pl.BlockSpec((1, 2, d_hidden), lambda c, i: (c, 0, 0)),
        out_shape=jax.ShapeDtypeStruct((n_split, 2, d_hidden), jnp.float32),
        compiler_params=pltpu.CompilerParams(
            dimension_semantics=("parallel", "arbitrary")),
    )(x_p, w1_t.astype(cd))

    # Tiny wrapper-side reductions / BN fold (on (2,32) / (32,32) arrays).
    s = jnp.sum(stats, axis=0)                        # (2, d_hidden)
    mean_u = s[0] / n
    var = jnp.maximum(s[1] / n - mean_u * mean_u, 0.0)          # guard negative rounding
    inv_std = lax.rsqrt(var + BN_EPS)
    scale = gamma * inv_std
    shift = beta - (mean_u + b1) * scale                        # mean_h = mean_u + b1
    w1_fold = (w1_t * scale[None, :]).astype(cd)                # BN folded into weights
    b1_fold = (b1 * scale + shift)[None, :]                     # (1, d_hidden), f32

    # ---- phase B: folded-BN Linear1 -> ReLU -> fused heads -> L2 normalize ----
    emb, s0, s1 = pl.pallas_call(
        functools.partial(_apply_kernel, d_proj=d_proj, k0=k0),
        grid=(n_tiles,),
        in_specs=[
            pl.BlockSpec((tile, d_in), lambda i: (i, 0)),
            pl.BlockSpec((d_in, d_hidden), lambda i: (0, 0)),
            pl.BlockSpec((1, d_hidden), lambda i: (0, 0)),
            pl.BlockSpec((d_hidden, d_out), lambda i: (0, 0)),
            pl.BlockSpec((1, d_out), lambda i: (0, 0)),
        ],
        out_specs=[
            pl.BlockSpec((tile, d_proj), lambda i: (i, 0)),
            pl.BlockSpec((tile, k0), lambda i: (i, 0)),
            pl.BlockSpec((tile, k1), lambda i: (i, 0)),
        ],
        out_shape=[
            jax.ShapeDtypeStruct((n_pad, d_proj), jnp.float32),
            jax.ShapeDtypeStruct((n_pad, k0), jnp.float32),
            jax.ShapeDtypeStruct((n_pad, k1), jnp.float32),
        ],
        compiler_params=pltpu.CompilerParams(
            dimension_semantics=("parallel",)),       # megacore-shardable on v7x
    )(x_p, w1_fold, b1_fold, w_fused.astype(cd), b_fused)

    if n_pad != n:
        emb, s0, s1 = emb[:n], s0[:n], s1[:n]
    return [emb, s0, s1]


def init_params(key, dims, num_clusters):
    """Deterministic synthetic parameters (PyTorch Linear weight shape = (out, in))."""
    d_in, d_hidden, d_proj = dims
    keys = jax.random.split(key, 8)
    s = 0.05
    return {
        "w1": s * jax.random.normal(keys[0], (d_hidden, d_in), jnp.float32),
        "b1": s * jax.random.normal(keys[1], (d_hidden,), jnp.float32),
        "gamma": 1.0 + s * jax.random.normal(keys[2], (d_hidden,), jnp.float32),
        "beta": s * jax.random.normal(keys[3], (d_hidden,), jnp.float32),
        "w2": s * jax.random.normal(keys[4], (d_proj, d_hidden), jnp.float32),
        "b2": s * jax.random.normal(keys[5], (d_proj,), jnp.float32),
        "p0": s * jax.random.normal(keys[6], (num_clusters[0], d_proj), jnp.float32),
        "p1": s * jax.random.normal(keys[7], (num_clusters[1], d_proj), jnp.float32),
    }


def reference_forward(x, params):
    """Pure-JAX reference of the PyTorch forward."""
    h = x @ params["w1"].T + params["b1"]
    mean = jnp.mean(h, axis=0, keepdims=True)
    var = jnp.mean((h - mean) ** 2, axis=0, keepdims=True)
    h = (h - mean) / jnp.sqrt(var + BN_EPS) * params["gamma"] + params["beta"]
    h = jnp.maximum(h, 0.0)
    z = h @ params["w2"].T + params["b2"]
    z = z / jnp.maximum(jnp.linalg.norm(z, axis=1, keepdims=True), NORM_EPS)
    return [z, z @ params["p0"].T, z @ params["p1"].T]


if __name__ == "__main__":
    dims = [32, 32, 16]
    num_clusters = [24, 12]
    N = 20  # deliberately NOT a tile multiple -> exercises padding + multi-tile stats

    key = jax.random.PRNGKey(0)
    k_x, k_p = jax.random.split(key)
    x = jax.random.normal(k_x, (N, dims[0]), jnp.float32)
    params = init_params(k_p, dims, num_clusters)

    refs = reference_forward(x, params)

    # f32-operand path, tiny batch tile so both grids have several steps
    # (multi-tile, split-core partial BN stats get exercised).
    outs = swav_prototypes_head(x, params, tile_n=8, n_split=2,
                                compute_dtype=jnp.float32)
    outs = [jax.block_until_ready(o) for o in outs]
    for o, r in zip(outs, refs):
        assert o.shape == r.shape
        assert jnp.allclose(o, r, atol=1e-5, rtol=1e-4), "f32 mismatch vs reference"

    # Default bf16 matmul-operand path (v5e/v6e/v7x native) -- loose tolerance.
    outs_bf16 = swav_prototypes_head(x, params, tile_n=8)
    outs_bf16 = [jax.block_until_ready(o) for o in outs_bf16]
    for o, r in zip(outs_bf16, refs):
        assert o.shape == r.shape
        assert jnp.allclose(o, r, atol=5e-2, rtol=5e-2), "bf16 mismatch vs reference"

    print("KERNEL_OK")
</pallas_src>

<mosaic_0001>
module attributes {stable_mosaic.version = 11 : i64} {
  func.func @_stats_kernel(%arg0: i32, %arg1: i32, %arg2: memref<8x32xf32, #tpu.memory_space<vmem>>, %arg3: memref<32x32xf32, #tpu.memory_space<vmem>>, %arg4: memref<1x2x32xf32, #tpu.memory_space<vmem>>) attributes {dimension_semantics = [#tpu.dimension_semantics<parallel>, #tpu.dimension_semantics<arbitrary>], iteration_bounds = array<i64: 2, 2>, scalar_prefetch = 0 : i64, scratch_operands = 0 : i64, tpu.core_type = #tpu.core_type<tc>, window_params = [{transform_indices = @transform_0, window_bounds = array<i64: 8, 32>}, {pipeline_mode = #tpu.pipeline_mode<synchronous>, transform_indices = @transform_1, window_bounds = array<i64: 32, 32>}, {transform_indices = @transform_2, window_bounds = array<i64: 1, 2, 32>}]} {
    %c0_i32 = arith.constant 0 : i32
    %0 = arith.cmpi eq, %arg1, %c0_i32 : i32
    %1 = arith.extui %0 : i1 to i32
    %c0_i32_0 = arith.constant 0 : i32
    %2 = arith.cmpi ne, %1, %c0_i32_0 : i32
    scf.if %2 {
      %cst_12 = arith.constant 0.000000e+00 : f32
      %16 = vector.broadcast %cst_12 : f32 to vector<1x2x32xf32>
      %c0_13 = arith.constant 0 : index
      %c0_14 = arith.constant 0 : index
      %c0_15 = arith.constant 0 : index
      %17 = vector.load %arg4[%c0_13, %c0_14, %c0_15] : memref<1x2x32xf32, #tpu.memory_space<vmem>>, vector<1x2x32xf32>
      tpu.vector_store %arg4[%c0_13, %c0_14, %c0_15], %16 {strides = array<i32>} : memref<1x2x32xf32, #tpu.memory_space<vmem>>, vector<1x2x32xf32>,
    } else {
    }
    %c0 = arith.constant 0 : index
    %c0_1 = arith.constant 0 : index
    %3 = vector.load %arg2[%c0, %c0_1] : memref<8x32xf32, #tpu.memory_space<vmem>>, vector<8x32xf32>
    %c0_2 = arith.constant 0 : index
    %c0_3 = arith.constant 0 : index
    %4 = vector.load %arg3[%c0_2, %c0_3] : memref<32x32xf32, #tpu.memory_space<vmem>>, vector<32x32xf32>
    %cst = arith.constant dense<0.000000e+00> : vector<8x32xf32>
    %5 = tpu.matmul %3, %4, %cst {dimension_numbers = #tpu.dot_dimension_numbers<[1], [0], [0], [1], [0, 0, 1, 1], [], []>} : vector<8x32xf32>, vector<32x32xf32>, vector<8x32xf32> -> vector<8x32xf32>
    %cst_4 = arith.constant dense<0.000000e+00> : vector<32xf32>
    %6 = vector.multi_reduction <add>, %5, %cst_4 [0] : vector<8x32xf32> to vector<32xf32>
    %7 = vector.shape_cast %6 : vector<32xf32> to vector<1x32xf32>
    %8 = arith.mulf %5, %5 : vector<8x32xf32>
    %cst_5 = arith.constant dense<0.000000e+00> : vector<32xf32>
    %9 = vector.multi_reduction <add>, %8, %cst_5 [0] : vector<8x32xf32> to vector<32xf32>
    %10 = vector.shape_cast %9 : vector<32xf32> to vector<1x32xf32>
    %11 = tpu.concatenate %7, %10 in 0 : vector<1x32xf32>, vector<1x32xf32> -> vector<2x32xf32>
    %c0_6 = arith.constant 0 : index
    %c0_7 = arith.constant 0 : index
    %c0_8 = arith.constant 0 : index
    %12 = vector.load %arg4[%c0_6, %c0_7, %c0_8] : memref<1x2x32xf32, #tpu.memory_space<vmem>>, vector<1x2x32xf32>
    %13 = vector.shape_cast %11 : vector<2x32xf32> to vector<1x2x32xf32>
    %14 = arith.addf %12, %13 : vector<1x2x32xf32>
    %c0_9 = arith.constant 0 : index
    %c0_10 = arith.constant 0 : index
    %c0_11 = arith.constant 0 : index
    %15 = vector.load %arg4[%c0_9, %c0_10, %c0_11] : memref<1x2x32xf32, #tpu.memory_space<vmem>>, vector<1x2x32xf32>
    tpu.vector_store %arg4[%c0_9, %c0_10, %c0_11], %14 {strides = array<i32>} : memref<1x2x32xf32, #tpu.memory_space<vmem>>, vector<1x2x32xf32>,
    return
  }
  func.func @transform_0(%arg0: i32, %arg1: i32) -> (i32, i32) {
    %c2_i32 = arith.constant 2 : i32
    %0 = arith.muli %arg0, %c2_i32 : i32
    %1 = arith.addi %0, %arg1 : i32
    %c0_i32 = arith.constant 0 : i32
    %c0_i32_0 = arith.constant 0 : i32
    return %1, %c0_i32 : i32, i32
  }
  func.func @transform_1(%arg0: i32, %arg1: i32) -> (i32, i32) {
    %c0_i32 = arith.constant 0 : i32
    %c0_i32_0 = arith.constant 0 : i32
    %c0_i32_1 = arith.constant 0 : i32
    return %c0_i32, %c0_i32_0 : i32, i32
  }
  func.func @transform_2(%arg0: i32, %arg1: i32) -> (i32, i32, i32) {
    %c0_i32 = arith.constant 0 : i32
    %c0_i32_0 = arith.constant 0 : i32
    %c0_i32_1 = arith.constant 0 : i32
    return %arg0, %c0_i32, %c0_i32_0 : i32, i32, i32
  }
}

</mosaic_0001>

<bundles_post_ra>
// kernel: tpu_custom_call.1
= control target key start
LH: loop header
LB: loop body
LE: loop exit
PB: predicated region body
PF: predicated region fallthrough
CT: control target
= control target key end

     0   :  { %s1048_s0 = inlined_call_operand.hbm [shape: f32[32,32], index: 0, kind: input, shape index: {}]   ;;  %s1049_s1 = inlined_call_operand.hbm [shape: f32[32,32], index: 1, kind: input, shape index: {}]   ;;  %s1050_s2 = inlined_call_operand.hbm [shape: f32[2,2,32], index: 2, kind: output, shape index: {}]  }
   0x1   :  { %1063 = sst [smem:[#allocation16_spill]] %s1049_s1 }
   0x2   :  { %1064 = sst [smem:[#allocation17_spill]] %s1050_s2 }
   0x3   :  { %7 = vsyncpa [#allocation3], 0 }
   0x4   :  { %9 = vsyncpa [#allocation3 + $0x1], 0 }
   0x5   :  { %10 = vsyncpa [#allocation6], 0 }
   0x6   :  { %11 = vsyncpa [#allocation4], 0 }
   0x7   :  { %13 = vsyncpa [#allocation4 + $0x1], 0  ;;  %s778_s9 = smov 0   ;;  %s780_s10 = smov 0  }
   0x8   :  { %s782_s11 = smov 0   ;;  %s784_s12 = smov 0  }
   0x9   :  { %s786_s13 = smov 0   ;;  %s788_s14 = smov 0  }
   0xa   :  { %s790_s15 = smov 0   ;;  %s792_s16 = smov 0  }
   0xb   :  { %s794_s17 = smov 0   ;;  %s796_s18 = smov 0  }
   0xc   :  { %s798_s19 = smov 0  }
   0xd LB: > { %1065 = sst [smem:[#allocation11_spill]] %s712_s9  ;;  %s407_s20 = sadd.s32 4294967295, %s752_s19   ;;  %s752_s19 = sphi %s798_s19, %s19_s19   ;;  %s748_s18 = sphi %s796_s18, %s1098_s18   ;;  %s744_s17 = sphi %s794_s17, %s1097_s17   ;;  %s740_s16 = sphi %s792_s16, %s1096_s16   ;;  %s736_s15 = sphi %s790_s15, %s1088_s15   ;;  %s732_s14 = sphi %s788_s14, %s1095_s14   ;;  %s728_s13 = sphi %s786_s13, %s1094_s13   ;;  %s724_s12 = sphi %s784_s12, %s1093_s12   ;;  %s720_s11 = sphi %s782_s11, %s1092_s11   ;;  %s716_s10 = sphi %s780_s10, %s1091_s10   ;;  %s712_s9 = sphi %s778_s9, %s1090_s9  }
   0xe   : > { %1066 = sst [smem:[#allocation12_spill]] %s744_s17  ;;  %s408_s21 = sadd.s32 4294967294, %s752_s19  }
   0xf   : > { %p55_p0 = scmp.ne.s32.totalorder %s728_s13, %s724_s12  ;;  %p834_p1 = scmp.eq.s32.totalorder %s407_s20, 0 }
  0x10   : > { %p99_p2 = scmp.ne.s32.totalorder %s720_s11, %s716_s10  ;;  %p100_p3 = scmp.eq.s32.totalorder %s407_s20, 3 }
  0x11   : > { %s1067_s22 = scalar_select %p834_p1, 1, 0 }
  0x12   : > { %p842_p4 = por %p834_p1, %p55_p0  ;;  %p105_p5 = scmp.ne.s32.totalorder %s716_s10, %s712_s9 }
  0x13   : > { %p848_p6 = por %p100_p3, %p99_p2  ;;  %p106_p7 = scmp.eq.s32.totalorder %s408_s21, 3 }
  0x14   : > { %s1068_s23 = scalar_select %p842_p4, 1, 0 }
  0x15   : > { %s1069_s24 = scalar_select %p848_p6, 1, 0 }
  0x16   : > { %p411_p8 = scmp.ge.s32.totalorder %s752_s19, 1  ;;  %p113_p9 = scmp.lt.s32.totalorder %s752_s19, 5 }
  0x17   : > { %1070 = sst [smem:[#allocation13_spill]] %s1069_s24  ;;  %p854_p10 = por %p106_p7, %p105_p5 }
  0x18   : > { %p858_p11 = pnand %p411_p8, %p113_p9  ;;  %s754_s27 = smov [#allocation5]  }
  0x19   : > { %s1071_s25 = scalar_select %p854_p10, 1, 0 }
  0x1a   : > { %s1073_s26 = scalar_select %p858_p11, 1, 0 }
  0x1b   : > { %1072 = sst [smem:[#allocation14_spill]] %s1071_s25  ;;  %s125_s28 = sshll.u32 %s754_s27, 4  ;;  %s126_s28 = int_to_ptr.vmem [resolvable:$true] %s125_s28 }
  0x1c   : > { %p457_p12 = pneg %p858_p11  ;;  %s1075_s1 = sld [smem:[#allocation16_spill]] }
  0x1e   : > { %p866_p13 = pnand %p457_p12, %p834_p1 }
  0x20   : > { %p570_p2 = pneg %p866_p13 }
  0x22   : > { %s568_s4 = scalar_lea.hbm %s1075_s1, 512 }
  0x23   : > { %p569_p0 = scmp.ne.s32.totalorder %s1075_s1, %s568_s4  ;;  %p575_p7 = scmp.lt.u32.totalorder %s568_s4, %s1075_s1 }
  0x25   : > { %p571_p3 = pnand %p570_p2, %p569_p0 }
  0x27   : > { %p572_p5 = pneg %p571_p3 }
  0x29   : > { %p577_p8 = pnand %p575_p7, %p572_p5 }
  0x2b   : > { %580 = shalt.err (!%p577_p8)
}
  0x2c   : > { %s581_s12 = scalar_lea.vmem %s126_s28, 512  ;;  %p589_p6 = scmp.lt.s32.totalorder %s126_s28, %s126_s28 }
  0x2d   : > { %p582_p9 = scmp.ne.s32.totalorder %s126_s28, %s581_s12  ;;  %p590_p1 = scmp.lt.s32.totalorder %s581_s12, %s581_s12 }
  0x2f   : > { %p584_p12 = pnand %p582_p9, %p570_p2  ;;  %p591_p4 = por %p590_p1, %p589_p6 }
  0x31   : > { %p585_p10 = pneg %p584_p12 }
  0x33   : > { %p592_p11 = pnand %p591_p4, %p585_p10 }
  0x35   : > { %595 = shalt.err (!%p592_p11)
}
  0x36   : > { %s755_s20 = smov 128   ;;  %s756_s21 = smov 8  }
  0x37   : > { %460 = dma.hbm_to_vmem [thread:$0]  (!%p866_p13), %s1075_s1, 512, %s126_s28, [#allocation6], %s755_s20, %s755_s20, %s756_s21  }
  0x38   : > { %s28_s3 = sadd.s32 1, %s744_s17  ;;  %s31_s4 = sadd.s32 1, %s748_s18 }
  0x39   : > { %p29_p1 = scmp.ge.s32.totalorder %s28_s3, 2  ;;  %s409_s5 = sshll.u32 %s748_s18, 1 }
  0x3a   : > { %s36_s6 = sadd.s32 %s744_s17, %s409_s5  ;;  %s42_s7 = sadd.s32 1, %s732_s14 }
  0x3b   : > { %s1100_s3 = smov (%p29_p1, %s28_s3), 0  ;;  %s1102_s4 = smov (!%p29_p1, %s31_s4), %s748_s18 }
  0x3c   : > { %p49_p4 = scmp.ne.s32.totalorder %s732_s14, %s728_s13  ;;  %p50_p6 = scmp.eq.s32.totalorder %s752_s19, 0 }
  0x3d   : > { %p33_p10 = scmp.ge.s32.totalorder %s1102_s4, 2  ;;  %s89_s29 = sadd.s32 1, %s720_s11 }
  0x3e   : > { %p898_p11 = por %p50_p6, %p49_p4  ;;  %p470_p13 = scmp.lt.s32.totalorder %s752_s19, 4 }
  0x3f   : > { %s1104_s4 = smov (%p33_p10, %s1102_s4), 0  ;;  %s139_s8 = sand.u32 1, %s732_s14  }
  0x40   : > { %1077 = sst [smem:[#allocation15_spill]] %s1104_s4  ;;  %s416_s12 = sshll.u32 %s36_s6, 7 }
  0x41   : > { %s410_s20 = sshll.u32 %s1104_s4, 1  ;;  %s86_s21 = ssub.s32 %s748_s18, %s1104_s4 }
  0x42   : > { %s38_s27 = sadd.s32 %s410_s20, %s1100_s3  ;;  %p87_p0 = scmp.eq.s32.totalorder %s86_s21, 0 }
  0x43   : > { %s39_s30 = ssub.s32 %s36_s6, %s38_s27  ;;  %s414_s5 = sshll.u32 %s139_s8, 3 }
  0x44   : > { %p40_p2 = scmp.eq.s32.totalorder %s39_s30, 0  ;;  %s919_s2 = scalar_lea.hbm %s1048_s0, %s416_s12 }
  0x45   : > { %s911_s1 = scalar_select %p87_p0, %s720_s11, %s89_s29  }
  0x46   : > { %s914_s17 = scalar_select %p40_p2, %s732_s14, %s42_s7  }
  0x47   : > { %s143_s24 = scalar_lea.vmem [#allocation2], %s414_s5  ;;  %p925_p3 = pnand %p470_p13, %p898_p11 }
  0x48   : > { %s152_s4 = sshll.u32 %s143_s24, 4  ;;  %s140_s7 = scalar_lea.sflag [#allocation3], %s139_s8  ;;  %s929_s4 = int_to_ptr.vmem [resolvable:$true] %s152_s4 }
  0x49   : > { %s596_s9 = scalar_lea.hbm %s919_s2, 128  ;;  %p598_p7 = pneg %p925_p3 }
  0x4a   : > { %p597_p5 = scmp.ne.s32.totalorder %s919_s2, %s596_s9  ;;  %s601_s29 = scalar_lea.hbm %s1048_s0, 512 }
  0x4b   : > { %p602_p12 = scmp.lt.u32.totalorder %s919_s2, %s1048_s0  ;;  %p603_p1 = scmp.lt.u32.totalorder %s601_s29, %s596_s9 }
  0x4c   : > { %p599_p8 = pnand %p598_p7, %p597_p5  ;;  %p605_p6 = scmp.lt.u32.totalorder %s596_s9, %s919_s2 }
  0x4d   : > { %p604_p4 = por %p603_p1, %p602_p12 }
  0x4e   : > { %p600_p9 = pneg %p599_p8 }
  0x4f   : > { %p606_p10 = por %p605_p6, %p604_p4 }
  0x51   : > { %p607_p11 = pnand %p606_p10, %p600_p9 }
  0x53   : > { %610 = shalt.err (!%p607_p11)
}
  0x54   : > { %s611_s8 = scalar_lea.vmem %s929_s4, 128  ;;  %s757_s20 = smov [#allocation2]  }
  0x55   : > { %p612_p13 = scmp.ne.s32.totalorder %s929_s4, %s611_s8  ;;  %s616_s21 = sshll.u32 %s757_s20, 4  ;;  %s617_s21 = int_to_ptr.vmem [resolvable:$false] %s616_s21 }
  0x56   : > { %s618_s27 = scalar_lea.vmem %s617_s21, 256  ;;  %p619_p5 = scmp.lt.s32.totalorder %s929_s4, %s617_s21 }
  0x57   : > { %p614_p0 = pnand %p612_p13, %p598_p7  ;;  %p620_p8 = scmp.lt.s32.totalorder %s618_s27, %s611_s8 }
  0x59   : > { %p615_p2 = pneg %p614_p0  ;;  %p621_p12 = por %p620_p8, %p619_p5 }
  0x5b   : > { %p622_p1 = pnand %p621_p12, %p615_p2 }
  0x5d   : > { %625 = shalt.err (!%p622_p1)
}
  0x5e   : > { %464 = dma.hbm_to_vmem [thread:$0]  (!%p925_p3), %s919_s2, 128, %s929_s4, %s140_s7  }
  0x5f   : > { %p1079_p9 = scmp.ne.s32.totalorder %s1073_s26, 0 }
  0x60   : > { %s163_s30 = sand.u32 (!%p1079_p9), 1, %s728_s13   ;;  %p1080_p7 = scmp.ne.s32.totalorder (!%p1079_p9), %s1068_s23, 0 }
  0x61   : > { %161 = sbr.rel (%p1079_p9) target bundleno = 371 (0x173), region = 28  ;;  %s959_s5 = sshll.u32 (!%p1079_p9), %s163_s30, 3 }
  0x62   : > { %s164_s9 = scalar_lea.sflag (!%p1079_p9), [#allocation3], %s163_s30  ;;  %s167_s24 = scalar_lea.vmem (!%p1079_p9), [#allocation2], %s959_s5 }
  0x68   : > { %699 = dma.done.wait (%p1080_p7), %s164_s9, 128  }
  0x69   : > { %701 = vsyncadd (%p1080_p7), %s164_s9, 4294967168  ;;  %p1081_p4 = scmp.ne.s32.totalorder %s1067_s22, 0 }
  0x6b   : > { %703 = dma.done.wait (%p1081_p4), [#allocation6], 512  }
  0x6c   : > { %705 = vsyncadd (%p1081_p4), [#allocation6], 4294966784  ;;  %s189_s2 = sand.u32 1, %s716_s10   ;;  %p421_p3 = scmp.ne.s32.totalorder %s736_s15, 0 }
  0x6d   : > { %s420_s26 = sshll.u32 %s189_s2, 1  ;;  %vm198_vm0 = vcmask (!%p421_p3), 254976   ;;  %v758_v0 = vmov (!%p421_p3), 0.0  }
  0x6e   : > { %s973_s4 = scalar_lea.vmem [#allocation7], %s420_s26  ;;  %197 = sbr.rel (%p421_p3) target bundleno = 117 (0x75), region = 40 }
  0x6f   : > { %199 = vst.msk [vmem:[%s973_s4] sm:$0x3] (!%p421_p3), %vm198_vm0, %v758_v0 }
  0x75 PF: > { %v201_v1 = vld [vmem:[#allocation5] sm:$0xff]  ;;  %v202_v2 = vld [vmem:[#allocation5 + $0x8] sm:$0xff]  ;;  %v203_v3 = vld [vmem:[#allocation5 + $0x10] sm:$0xff]  ;;  %v759_v4 = vmov 0.0|0.0   ;;  %vm760_vm1 = vmmov 0   ;;  %v761_v7 = vmov 0.0  }
  0x76   : > { %443 = vmatprep.subr.bf16.mxu0 %v759_v4  ;;  %v444_v5 = vpack.c.bf16 %v202_v2, %v201_v1  ;;  %v204_v6 = vld [vmem:[#allocation5 + $0x18] sm:$0xff]  ;;  %440 = vmatprep.mubr.msk.f32.mxu0 %vm760_vm1, %v761_v7  ;;  %vm205_vm2 = vcmask 261120   ;;  %s1082_s15 = sld [smem:[#allocation13_spill]]  ;;  %vm294_vm3 = vcmask 1040384   ;;  %v296_v27 = vld [vmem:[%s973_s4] sm:$0x3] }
  0x77   : > { %v447_v8 = vpack.c.bf16 %v204_v6, %v203_v3  ;;  %v200_v9 = vld [vmem:[%s167_s24] sm:$0xff]  ;;  %s424_s22 = sshll.u32 %s740_s16, 5  ;;  %s314_s23 = sshll.u32 %s973_s4, 4  ;;  %vm298_vm4 = vcmask 254976   ;;  %s985_s23 = int_to_ptr.vmem [resolvable:$true] %s314_s23 }
  0x78   : > { %445 = vmatpush3.bf16.msra.mxu0 %v444_v5  ;;  %s1083_s25 = sld [smem:[#allocation17_spill]]  ;;  %s301_s28 = scalar_lea.sflag [#allocation4], %s189_s2 }
  0x79   : > { %446 = vmatprep.subr.bf16.mxu0 %v759_v4  ;;  %s626_s12 = scalar_lea.vmem %s985_s23, 32  ;;  %s762_s16 = smov [#allocation7]  }
  0x7a   : > { %p627_p6 = scmp.ne.s32.totalorder %s985_s23, %s626_s12  ;;  %s630_s8 = sshll.u32 %s762_s16, 4  ;;  %s631_s8 = int_to_ptr.vmem [resolvable:$false] %s630_s8 }
  0x7b   : > { %s632_s20 = scalar_lea.vmem %s631_s8, 64  ;;  %p633_p0 = scmp.lt.s32.totalorder %s985_s23, %s631_s8 }
  0x7c   : > { %448 = vmatpush3.bf16.msra.mxu0 %v447_v8  ;;  %p1084_p10 = scmp.ne.s32.totalorder %s1082_s15, 0  ;;  %p634_p2 = scmp.lt.s32.totalorder %s632_s20, %s626_s12 }
  0x7e   : > { %s983_s29 = scalar_lea.hbm %s1083_s25, %s424_s22  ;;  %p628_p11 = pnand %p627_p6, %p1084_p10 }
  0x7f   : > { %441 = vmatmul.mubr.msk.f32.vlgmr.msra.gmra.mrb[0].mxu0 %vm205_vm2, %v200_v9  ;;  %p635_p5 = por %p634_p2, %p633_p0 }
  0x80   : > { %p629_p13 = pneg %p628_p11 }
  0x82   : > { %p636_p8 = pnand %p635_p5, %p629_p13 }
 0x152   : > { %v275_v10 = vpop.f32.mrb[0].mxu0 }
 0x153   : > { %v279_v11 = vsel %vm205_vm2, %v275_v10, 0.0  ;;  %v286_v12 = vmul.f32 %v275_v10, %v275_v10  ;;  %v442_v13 = vpop.f32.mrb[1].mxu0 }
 0x154   : > { %v280_v14 = vrot.slane %v279_v11, 4 }
 0x155   : > { %v287_v15 = vsel %vm205_vm2, %v286_v12, 0.0 }
 0x156   : > { %v281_v16 = vadd.f32 %v280_v14, %v279_v11  ;;  %v288_v17 = vrot.slane %v287_v15, 4 }
 0x158   : > { %v282_v18 = vrot.slane %v281_v16, 2  ;;  %v289_v19 = vadd.f32 %v288_v17, %v287_v15 }
 0x15a   : > { %v283_v20 = vadd.f32 %v282_v18, %v281_v16  ;;  %v290_v21 = vrot.slane %v289_v19, 2 }
 0x15c   : > { %v284_v22 = vrot.slane %v283_v20, 1  ;;  %v291_v23 = vadd.f32 %v290_v21, %v289_v19 }
 0x15e   : > { %v292_v24 = vrot.slane %v291_v23, 1  ;;  %v285_v25 = vadd.f32 %v284_v22, %v283_v20 }
 0x160   : > { %v293_v26 = vadd.f32 %v292_v24, %v291_v23 }
 0x162   : > { %v295_v28 = vsel %vm294_vm3, %v285_v25, %v293_v26 }
 0x163   : > { %v297_v29 = vadd.f32 %v296_v27, %v295_v28 }
 0x165   : > { %299 = vst.msk [vmem:[%s973_s4] sm:$0x3] %vm298_vm4, %v297_v29 }
 0x166   : > { %639 = shalt.err (!%p636_p8)
}
 0x167   : > { %s640_s21 = scalar_lea.hbm %s983_s29, 32  ;;  %s644_s5 = scalar_lea.hbm %s1083_s25, 64 }
 0x168   : > { %p641_p12 = scmp.ne.s32.totalorder %s983_s29, %s640_s21  ;;  %p645_p7 = scmp.lt.u32.totalorder %s983_s29, %s1083_s25 }
 0x169   : > { %p646_p4 = scmp.lt.u32.totalorder %s644_s5, %s640_s21  ;;  %p648_p6 = scmp.lt.u32.totalorder %s640_s21, %s983_s29 }
 0x16a   : > { %p642_p1 = pnand %p641_p12, %p1084_p10 }
 0x16b   : > { %p647_p3 = por %p646_p4, %p645_p7 }
 0x16c   : > { %p643_p9 = pneg %p642_p1 }
 0x16d   : > { %p649_p11 = por %p648_p6, %p647_p3 }
 0x16f   : > { %p650_p13 = pnand %p649_p11, %p643_p9 }
 0x171   : > { %653 = shalt.err (!%p650_p13)
}
 0x172   : > { %455 = dma.vmem_to_hbm [thread:$0]  (%p1084_p10), %s985_s23, 32, %s983_s29, %s301_s28  }
 0x173 PF: > { %s1085_s2 = sld [smem:[#allocation11_spill]]  ;;  %s1086_s26 = sld [smem:[#allocation14_spill]] }
 0x174   : > { %p472_p0 = scmp.ge.s32.totalorder %s752_s19, 2 }
 0x179   : > { %s326_s4 = sand.u32 1, %s1085_s2   ;;  %p1087_p2 = scmp.ne.s32.totalorder %s1086_s26, 0 }
 0x17a   : > { %s327_s22 = scalar_lea.sflag [#allocation4], %s326_s4 }
 0x17b   : > { %p466_p5 = pnand %p472_p0, %p1087_p2 }
 0x17d   : > { %707 = dma.done.wait (!%p466_p5), %s327_s22, 32  }
 0x17e   : > { %709 = vsyncadd (!%p466_p5), %s327_s22, 4294967264  ;;  %s19_s19 = sadd.s32 1, %s752_s19   ;;  %s1088_s15 = sld [smem:[#allocation12_spill]] }
 0x17f   : > { %p16_p8 = scmp.ge.s32.totalorder %s19_s19, 6   ;;  %s1089_s23 = sld [smem:[#allocation15_spill]] }
 0x180   : > { %s1090_s9 = smov %s716_s10  ;;  %s1091_s10 = smov %s720_s11 }
 0x181   : > { %s1092_s11 = smov %s911_s1  ;;  %s1093_s12 = smov %s728_s13 }
 0x182   : > { %s1094_s13 = smov %s732_s14  ;;  %s1095_s14 = smov %s914_s17 }
 0x183   : > { %s1096_s16 = smov %s748_s18  ;;  %s1097_s17 = smov %s1100_s3 }
 0x184   :  { %18 = sbr.rel (!%p16_p8) target bundleno = 13 (0xd), region = 81 }
 0x185   : > { %s1098_s18 = smov %s1089_s23 }
 0x18b   :  { %332 = vsyncpa [#allocation3], 1 }
 0x18c   :  { %334 = vsyncpa [#allocation3 + $0x1], 1 }
 0x18d   :  { %335 = vsyncpa [#allocation6], 1 }
 0x18e   :  { %336 = vsyncpa [#allocation4], 1 }
 0x18f   :  { %338 = vsyncpa [#allocation4 + $0x1], 1 }

</bundles_post_ra>
